<compile_context>
chip_gen: v5e
topology: v5e:2x2
jax: 0.10.0
libtpu: 0.0.40
codegen_flags: <defaults>
</compile_context>

<pallas_src>
import jax
import jax.numpy as jnp
from jax import lax
from jax.experimental import pallas as pl
from jax.experimental.pallas import tpu as pltpu

_INV_SQRT2 = 0.7071067811865476


def _gelu_f32(h):
    # Exact erf-based GELU (PyTorch nn.GELU() default), computed in f32.
    return 0.5 * h * (1.0 + lax.erf(h * jnp.float32(_INV_SQRT2)))


# --------------------------------------------------------------------------
# Kernels
# --------------------------------------------------------------------------
def ffn_resident_kernel(x_ref, w1_ref, b1_ref, w2_ref, b2_ref, o_ref):
    """Weights fully VMEM-resident; grid = (row_tiles,)."""
    h = jnp.dot(x_ref[...], w1_ref[...], preferred_element_type=jnp.float32)
    h = _gelu_f32(h + b1_ref[...].astype(jnp.float32))
    # Dropout (eval mode) -> identity.
    out = jnp.dot(h.astype(w2_ref.dtype), w2_ref[...],
                  preferred_element_type=jnp.float32)
    out = out + b2_ref[...].astype(jnp.float32)
    # Dropout (eval mode) -> identity.
    o_ref[...] = out.astype(o_ref.dtype)


def ffn_stream_kernel(x_ref, w1_ref, b1_ref, w2_ref, b2_ref, o_ref, acc_ref):
    """Hidden dim streamed as the last (reduction) grid axis."""
    k = pl.program_id(1)

    @pl.when(k == 0)
    def _init():
        acc_ref[...] = jnp.zeros_like(acc_ref)

    # Linear 1 k-tile: (tm, D) @ (D, tk) -> f32; bias + GELU in f32.
    h = jnp.dot(x_ref[...], w1_ref[...], preferred_element_type=jnp.float32)
    h = _gelu_f32(h + b1_ref[...].astype(jnp.float32))
    # Dropout (eval mode) -> identity.

    # Linear 2 partial product: (tm, tk) @ (tk, D), accumulated in f32.
    acc_ref[...] += jnp.dot(h.astype(w2_ref.dtype), w2_ref[...],
                            preferred_element_type=jnp.float32)

    @pl.when(k == pl.num_programs(1) - 1)
    def _finalize():
        out = acc_ref[...] + b2_ref[...].astype(jnp.float32)
        # Dropout (eval mode) -> identity.
        o_ref[...] = out.astype(o_ref.dtype)


# --------------------------------------------------------------------------
# Wrapper helpers
# --------------------------------------------------------------------------
def _round_up(x, m):
    return ((x + m - 1) // m) * m


def _tpu_vmem_capacity():
    try:
        cap = int(pltpu.get_tpu_info().vmem_capacity_bytes)
        if cap > 0:
            return cap
    except Exception:
        pass
    return 64 << 20  # conservative fallback (v7x per-TC physical size)


def _generation_defaults():
    cap = _tpu_vmem_capacity()
    if cap <= (64 << 20) + (1 << 20):
        # v7x-class: 64 MiB per TC -> smaller row/hidden tiles, ~80% budget.
        return dict(tm=512, tk=256, usable=int(cap * 0.80))
    # v5e / v6e: 128 MiB -> big row tiles to reach MXU roofline, ~85% budget.
    return dict(tm=1024, tk=512, usable=int(cap * 0.85))


def _largest_aligned_divisor(n, pref):
    """Largest multiple of 128 that divides n and is <= pref (n % 128 == 0)."""
    t = max(128, (pref // 128) * 128)
    while t >= 128:
        if n % t == 0:
            return t
        t -= 128
    return 128


# --------------------------------------------------------------------------
# Public forward
# --------------------------------------------------------------------------
def ffn_forward(x, w1, b1, w2, b2, *, matmul_dtype=jnp.bfloat16,
                tm=None, tk=None, force_stream=False):
    """x: (batch, seq, model_dim). Returns same shape, dtype of x."""
    batch, seq, model_dim = x.shape
    hidden_dim = w1.shape[1]
    n_rows = batch * seq
    out_dtype = x.dtype

    cfg = _generation_defaults()
    tm_pref = int(tm) if tm is not None else cfg["tm"]
    tk_pref = int(tk) if tk is not None else cfg["tk"]
    usable = cfg["usable"]
    headroom = 4 << 20  # Mosaic internal scratch, misc.

    # bf16 MXU inputs by default; biases stay f32 for the accumulate path.
    if matmul_dtype is not None and x.dtype != matmul_dtype:
        x_mm, w1_mm, w2_mm = (x.astype(matmul_dtype), w1.astype(matmul_dtype),
                              w2.astype(matmul_dtype))
    else:
        x_mm, w1_mm, w2_mm = x, w1, w2
    in_bytes = x_mm.dtype.itemsize
    w_bytes = w1_mm.dtype.itemsize
    out_bytes = jnp.dtype(out_dtype).itemsize
    b_bytes = 4
    sub = 16 if in_bytes < 4 else 8  # sublane granularity for row tiles

    # ---- row tile ---------------------------------------------------------
    tm_eff = min(max(sub, (tm_pref // sub) * sub), _round_up(n_rows, sub))
    # Megacore: avoid a single oversized row tile when rows are plentiful.
    if n_rows > 256 and pl.cdiv(n_rows, tm_eff) < 2:
        tm_eff = max(sub, _round_up((n_rows + 1) // 2, sub))

    # ---- hidden (reduction) tile: 128-aligned, hidden padded to match -----
    hidden_pad = _round_up(hidden_dim, 128)
    tk_eff = _largest_aligned_divisor(hidden_pad, min(tk_pref, hidden_pad))

    # ---- VMEM footprint models (tiles counted once; BlockSpec dbl-buffers) -
    def resident_bytes(tm_):
        tiles = 2 * tm_ * model_dim * (in_bytes + out_bytes)
        weights = 2 * (2 * model_dim * hidden_dim * w_bytes
                       + (hidden_dim + model_dim) * b_bytes)
        interm = tm_ * hidden_dim * (4 + w_bytes) + tm_ * model_dim * 4
        return tiles + weights + interm

    def stream_bytes(tm_, tk_):
        tiles = 2 * (tm_ * model_dim * in_bytes
                     + model_dim * tk_ * w_bytes + tk_ * b_bytes
                     + tk_ * model_dim * w_bytes + model_dim * b_bytes
                     + tm_ * model_dim * out_bytes)
        scratch = tm_ * model_dim * 4                  # f32 accumulator
        interm = tm_ * tk_ * (4 + w_bytes)             # GELU intermediate
        return tiles + scratch + interm

    use_resident = (not force_stream
                    and resident_bytes(tm_eff) + headroom <= usable)

    if not use_resident:
        # Shrink row tile, then hidden tile, until the streamed footprint fits.
        while stream_bytes(tm_eff, tk_eff) + headroom > usable and tm_eff > 64:
            tm_eff = max(sub, ((tm_eff // 2) // sub) * sub)
        while stream_bytes(tm_eff, tk_eff) + headroom > usable and tk_eff > 128:
            tk_eff = max(128, ((tk_eff // 2) // 128) * 128)

    padded_rows = _round_up(n_rows, tm_eff)
    est = resident_bytes(tm_eff) if use_resident else stream_bytes(tm_eff, tk_eff)
    vmem_limit = int(min(max(est + headroom, 16 << 20), usable))

    # ---- operand prep ------------------------------------------------------
    x2d = x_mm.reshape(n_rows, model_dim)
    if padded_rows != n_rows:
        x2d = jnp.pad(x2d, ((0, padded_rows - n_rows), (0, 0)))
    b1_f32 = b1.astype(jnp.float32)
    b2_2d = b2.astype(jnp.float32).reshape(1, model_dim)

    if use_resident:
        grid = (padded_rows // tm_eff,)
        out2d = pl.pallas_call(
            ffn_resident_kernel,
            out_shape=jax.ShapeDtypeStruct((padded_rows, model_dim), out_dtype),
            grid=grid,
            in_specs=[
                pl.BlockSpec((tm_eff, model_dim), lambda i: (i, 0)),        # x
                pl.BlockSpec((model_dim, hidden_dim), lambda i: (0, 0)),    # W1
                pl.BlockSpec((1, hidden_dim), lambda i: (0, 0)),            # b1
                pl.BlockSpec((hidden_dim, model_dim), lambda i: (0, 0)),    # W2
                pl.BlockSpec((1, model_dim), lambda i: (0, 0)),             # b2
            ],
            out_specs=pl.BlockSpec((tm_eff, model_dim), lambda i: (i, 0)),
            compiler_params=pltpu.CompilerParams(
                dimension_semantics=("parallel",),
                vmem_limit_bytes=vmem_limit),
        )(x2d, w1_mm, b1_f32.reshape(1, hidden_dim), w2_mm, b2_2d)
    else:
        # Pad hidden dim with zeros (zero cols of W1 / rows of W2 contribute 0).
        if hidden_pad != hidden_dim:
            w1_p = jnp.pad(w1_mm, ((0, 0), (0, hidden_pad - hidden_dim)))
            b1_p = jnp.pad(b1_f32, (0, hidden_pad - hidden_dim))
            w2_p = jnp.pad(w2_mm, ((0, hidden_pad - hidden_dim), (0, 0)))
        else:
            w1_p, b1_p, w2_p = w1_mm, b1_f32, w2_mm

        grid = (padded_rows // tm_eff, hidden_pad // tk_eff)
        out2d = pl.pallas_call(
            ffn_stream_kernel,
            out_shape=jax.ShapeDtypeStruct((padded_rows, model_dim), out_dtype),
            grid=grid,
            in_specs=[
                pl.BlockSpec((tm_eff, model_dim), lambda i, k: (i, 0)),     # x
                pl.BlockSpec((model_dim, tk_eff), lambda i, k: (0, k)),     # W1
                pl.BlockSpec((1, tk_eff), lambda i, k: (0, k)),             # b1
                pl.BlockSpec((tk_eff, model_dim), lambda i, k: (k, 0)),     # W2
                pl.BlockSpec((1, model_dim), lambda i, k: (0, 0)),          # b2
            ],
            out_specs=pl.BlockSpec((tm_eff, model_dim), lambda i, k: (i, 0)),
            scratch_shapes=[pltpu.VMEM((tm_eff, model_dim), jnp.float32)],
            compiler_params=pltpu.CompilerParams(
                dimension_semantics=("parallel", "arbitrary"),
                vmem_limit_bytes=vmem_limit),
        )(x2d, w1_p, b1_p.reshape(1, hidden_pad), w2_p, b2_2d)

    if padded_rows != n_rows:
        out2d = out2d[:n_rows]
    return out2d.reshape(batch, seq, model_dim)


# --------------------------------------------------------------------------
# Demo / self-test
# --------------------------------------------------------------------------
def init_params(key, model_dim, hidden_dim):
    """Deterministic init mimicking nn.Linear's uniform(-1/sqrt(fan_in), +)."""
    k1, k2, k3, k4 = jax.random.split(key, 4)
    bound1 = 1.0 / (model_dim ** 0.5)
    bound2 = 1.0 / (hidden_dim ** 0.5)
    w1 = jax.random.uniform(k1, (model_dim, hidden_dim), jnp.float32,
                            -bound1, bound1)
    b1 = jax.random.uniform(k2, (hidden_dim,), jnp.float32, -bound1, bound1)
    w2 = jax.random.uniform(k3, (hidden_dim, model_dim), jnp.float32,
                            -bound2, bound2)
    b2 = jax.random.uniform(k4, (model_dim,), jnp.float32, -bound2, bound2)
    return w1, b1, w2, b2


if __name__ == "__main__":
    key = jax.random.PRNGKey(0)
    batch, seq, model_dim, hidden_dim = 2, 8, 32, 64

    kx, kp = jax.random.split(key)
    x = jax.random.normal(kx, (batch, seq, model_dim), jnp.float32)
    w1, b1, w2, b2 = init_params(kp, model_dim, hidden_dim)

    # Pure-f32 reference (eval-mode dropout = identity, exact erf GELU).
    h_f32 = jax.nn.gelu(x.reshape(-1, model_dim) @ w1 + b1, approximate=False)
    ref_f32 = (h_f32 @ w2 + b2).reshape(batch, seq, model_dim)

    # bf16-mirrored reference (same bf16 rounding points as the kernel).
    xb = x.astype(jnp.bfloat16).astype(jnp.float32)
    w1b = w1.astype(jnp.bfloat16).astype(jnp.float32)
    w2b = w2.astype(jnp.bfloat16).astype(jnp.float32)
    h_b = jax.nn.gelu(xb.reshape(-1, model_dim) @ w1b + b1, approximate=False)
    h_b = h_b.astype(jnp.bfloat16).astype(jnp.float32)
    ref_b = (h_b @ w2b + b2).reshape(batch, seq, model_dim)

    # 1) Default path (bf16 matmuls, weights resident for this tiny model).
    out = jax.block_until_ready(ffn_forward(x, w1, b1, w2, b2))
    assert out.shape == x.shape and out.dtype == x.dtype
    assert jnp.allclose(out, ref_b, atol=1e-2, rtol=1e-2)

    # 2) Forced hidden-streaming path (padded hidden dim, f32 accumulator).
    out_s = jax.block_until_ready(
        ffn_forward(x, w1, b1, w2, b2, force_stream=True))
    assert out_s.shape == x.shape and out_s.dtype == x.dtype
    assert jnp.allclose(out_s, ref_b, atol=1e-2, rtol=1e-2)

    # 3) Full-precision path (no bf16 cast) against the pure-f32 reference.
    out_f = jax.block_until_ready(
        ffn_forward(x, w1, b1, w2, b2, matmul_dtype=None))
    assert jnp.allclose(out_f, ref_f32, atol=1e-4, rtol=1e-4)

    print("KERNEL_OK")
</pallas_src>

<mosaic_0001>
module attributes {stable_mosaic.version = 11 : i64} {
  func.func @ffn_resident_kernel(%arg0: i32, %arg1: memref<16x32xbf16, #tpu.memory_space<vmem>>, %arg2: memref<32x64xbf16, #tpu.memory_space<vmem>>, %arg3: memref<1x64xf32, #tpu.memory_space<vmem>>, %arg4: memref<64x32xbf16, #tpu.memory_space<vmem>>, %arg5: memref<1x32xf32, #tpu.memory_space<vmem>>, %arg6: memref<16x32xf32, #tpu.memory_space<vmem>>) attributes {dimension_semantics = [#tpu.dimension_semantics<parallel>], iteration_bounds = array<i64: 1>, scalar_prefetch = 0 : i64, scratch_operands = 0 : i64, tpu.core_type = #tpu.core_type<tc>, window_params = [{transform_indices = @transform_0, window_bounds = array<i64: 16, 32>}, {pipeline_mode = #tpu.pipeline_mode<synchronous>, transform_indices = @transform_1, window_bounds = array<i64: 32, 64>}, {pipeline_mode = #tpu.pipeline_mode<synchronous>, transform_indices = @transform_2, window_bounds = array<i64: 1, 64>}, {pipeline_mode = #tpu.pipeline_mode<synchronous>, transform_indices = @transform_3, window_bounds = array<i64: 64, 32>}, {pipeline_mode = #tpu.pipeline_mode<synchronous>, transform_indices = @transform_4, window_bounds = array<i64: 1, 32>}, {transform_indices = @transform_5, window_bounds = array<i64: 16, 32>}]} {
    %c0 = arith.constant 0 : index
    %c0_0 = arith.constant 0 : index
    %0 = vector.load %arg1[%c0, %c0_0] : memref<16x32xbf16, #tpu.memory_space<vmem>>, vector<16x32xbf16>
    %c0_1 = arith.constant 0 : index
    %c0_2 = arith.constant 0 : index
    %1 = vector.load %arg2[%c0_1, %c0_2] : memref<32x64xbf16, #tpu.memory_space<vmem>>, vector<32x64xbf16>
    %cst = arith.constant dense<0.000000e+00> : vector<16x64xf32>
    %2 = tpu.matmul %0, %1, %cst {dimension_numbers = #tpu.dot_dimension_numbers<[1], [0], [0], [1], [0, 0, 1, 1], [], []>} : vector<16x32xbf16>, vector<32x64xbf16>, vector<16x64xf32> -> vector<16x64xf32>
    %c0_3 = arith.constant 0 : index
    %c0_4 = arith.constant 0 : index
    %3 = vector.load %arg3[%c0_3, %c0_4] : memref<1x64xf32, #tpu.memory_space<vmem>>, vector<1x64xf32>
    %4 = vector.broadcast %3 : vector<1x64xf32> to vector<16x64xf32>
    %5 = arith.addf %2, %4 : vector<16x64xf32>
    %cst_5 = arith.constant 5.000000e-01 : f32
    %6 = vector.broadcast %cst_5 : f32 to vector<16x64xf32>
    %7 = arith.mulf %6, %5 : vector<16x64xf32>
    %cst_6 = arith.constant 0.707106769 : f32
    %8 = vector.broadcast %cst_6 : f32 to vector<16x64xf32>
    %9 = arith.mulf %5, %8 : vector<16x64xf32>
    %10 = math.erf %9 : vector<16x64xf32>
    %cst_7 = arith.constant 1.000000e+00 : f32
    %11 = vector.broadcast %cst_7 : f32 to vector<16x64xf32>
    %12 = arith.addf %11, %10 : vector<16x64xf32>
    %13 = arith.mulf %7, %12 : vector<16x64xf32>
    %14 = arith.truncf %13 : vector<16x64xf32> to vector<16x64xbf16>
    %c0_8 = arith.constant 0 : index
    %c0_9 = arith.constant 0 : index
    %15 = vector.load %arg4[%c0_8, %c0_9] : memref<64x32xbf16, #tpu.memory_space<vmem>>, vector<64x32xbf16>
    %cst_10 = arith.constant dense<0.000000e+00> : vector<16x32xf32>
    %16 = tpu.matmul %14, %15, %cst_10 {dimension_numbers = #tpu.dot_dimension_numbers<[1], [0], [0], [1], [0, 0, 1, 1], [], []>} : vector<16x64xbf16>, vector<64x32xbf16>, vector<16x32xf32> -> vector<16x32xf32>
    %c0_11 = arith.constant 0 : index
    %c0_12 = arith.constant 0 : index
    %17 = vector.load %arg5[%c0_11, %c0_12] : memref<1x32xf32, #tpu.memory_space<vmem>>, vector<1x32xf32>
    %18 = vector.broadcast %17 : vector<1x32xf32> to vector<16x32xf32>
    %19 = arith.addf %16, %18 : vector<16x32xf32>
    %c0_13 = arith.constant 0 : index
    %c0_14 = arith.constant 0 : index
    %20 = vector.load %arg6[%c0_13, %c0_14] : memref<16x32xf32, #tpu.memory_space<vmem>>, vector<16x32xf32>
    tpu.vector_store %arg6[%c0_13, %c0_14], %19 {strides = array<i32>} : memref<16x32xf32, #tpu.memory_space<vmem>>, vector<16x32xf32>,
    return
  }
  func.func @transform_0(%arg0: i32) -> (i32, i32) {
    %c0_i32 = arith.constant 0 : i32
    %c0_i32_0 = arith.constant 0 : i32
    return %arg0, %c0_i32 : i32, i32
  }
  func.func @transform_1(%arg0: i32) -> (i32, i32) {
    %c0_i32 = arith.constant 0 : i32
    %c0_i32_0 = arith.constant 0 : i32
    %c0_i32_1 = arith.constant 0 : i32
    return %c0_i32, %c0_i32_0 : i32, i32
  }
  func.func @transform_2(%arg0: i32) -> (i32, i32) {
    %c0_i32 = arith.constant 0 : i32
    %c0_i32_0 = arith.constant 0 : i32
    %c0_i32_1 = arith.constant 0 : i32
    return %c0_i32, %c0_i32_0 : i32, i32
  }
  func.func @transform_3(%arg0: i32) -> (i32, i32) {
    %c0_i32 = arith.constant 0 : i32
    %c0_i32_0 = arith.constant 0 : i32
    %c0_i32_1 = arith.constant 0 : i32
    return %c0_i32, %c0_i32_0 : i32, i32
  }
  func.func @transform_4(%arg0: i32) -> (i32, i32) {
    %c0_i32 = arith.constant 0 : i32
    %c0_i32_0 = arith.constant 0 : i32
    %c0_i32_1 = arith.constant 0 : i32
    return %c0_i32, %c0_i32_0 : i32, i32
  }
  func.func @transform_5(%arg0: i32) -> (i32, i32) {
    %c0_i32 = arith.constant 0 : i32
    %c0_i32_0 = arith.constant 0 : i32
    return %arg0, %c0_i32 : i32, i32
  }
}

</mosaic_0001>

<bundles_post_ra>
// kernel: tpu_custom_call.1
= control target key start
LH: loop header
LB: loop body
LE: loop exit
PB: predicated region body
PF: predicated region fallthrough
CT: control target
= control target key end

     0   :  { %s388_s0 = inlined_call_operand.vmem [shape: bf16[16,32], index: 0, kind: input, shape index: {}]   ;;  %s389_s1 = inlined_call_operand.vmem [shape: bf16[32,64], index: 1, kind: input, shape index: {}]   ;;  %s390_s2 = inlined_call_operand.vmem [shape: f32[1,64], index: 2, kind: input, shape index: {}]   ;;  %s391_s3 = inlined_call_operand.vmem [shape: bf16[64,32], index: 3, kind: input, shape index: {}]   ;;  %s392_s4 = inlined_call_operand.vmem [shape: f32[1,32], index: 4, kind: input, shape index: {}]   ;;  %s393_s5 = inlined_call_operand.hbm [shape: f32[16,32], index: 5, kind: output, shape index: {}]  }
   0x1   :  { %v264_v0 = vld [vmem:[%s389_s1 + $0x8] sm:$0xff]  ;;  %v263_v1 = vld [vmem:[%s389_s1] sm:$0xff] }
   0x2   :  { %59 = vmatpush.bf16.msra.mxu0 %v264_v0 }
   0x3   :  { %10 = vsyncpa [#allocation3], 0  ;;  %v262_v2 = vld [vmem:[%s388_s0] sm:$0xff]  ;;  %vm49_vm0 = vcmask 261120   ;;  %v268_v22 = vld [vmem:[%s391_s3 + $0x18] sm:$0xff]  ;;  %vm192_vm9 = vcmask 523264  }
   0x4   :  { %v272_v3 = vld [vmem:[%s390_s2] ss:$0 sm:$0xff]  ;;  %200 = vmatpush.bf16.msra.mxu1 %v268_v22  ;;  %v267_v30 = vld [vmem:[%s391_s3 + $0x10] sm:$0xff]  ;;  %v266_v38 = vld [vmem:[%s391_s3 + $0x8] sm:$0xff]  ;;  %s304_s7 = smov [#allocation2]   ;;  %s218_s11 = sshll.u32 %s393_s5, 4  ;;  %s219_s11 = int_to_ptr.hbm [resolvable:$true] %s218_s11 }
   0x5   :  { %v265_v44 = vld [vmem:[%s391_s3] sm:$0xff]  ;;  %s216_s8 = sshll.u32 %s304_s7, 4  ;;  %s305_s12 = smov 128   ;;  %s217_s8 = int_to_ptr.vmem [resolvable:$true] %s216_s8 }
   0x6   :  { %60 = vmatpush.bf16.msra.mxu0 %v263_v1  ;;  %s306_s13 = smov 8  }
   0x8   :  { %201 = vmatpush.bf16.msra.mxu1 %v267_v30 }
   0x9   :  { %242 = vmatmul.msk.bf16.vlgmr.msra.gmra.mxu0 %vm49_vm0, %v262_v2 }
   0xc   :  { %202 = vmatpush.bf16.msra.mxu1 %v266_v38 }
  0x10   :  { %203 = vmatpush.bf16.msra.mxu1 %v265_v44 }
  0x86   :  { %v62_v4 = vpop.f32.mrf.mxu0 }
  0x87   :  { %v350_v5 = vadd.f32 %v272_v3, %v62_v4 }
  0x89   :  { %v353_v6 = vmul.f32 0.70710677, %v350_v5 }
  0x8b   :  { %v71_v7 = vmul.f32 %v353_v6, %v353_v6 }
  0x8d   :  { %v72_v8 = vmin.f32 %v71_v7, 16.0 }
  0x8e   :  { %v64_v9 = vpop.f32.mrf.mxu0 }
  0x8f   :  { %v73_v10 = vmul.f32 2.1237322e-06, %v72_v8  ;;  %v84_v11 = vmul.f32 3.8918573e-05, %v72_v8  ;;  %v357_v12 = vadd.f32 %v272_v3, %v64_v9 }
  0x91   :  { %v74_v13 = vadd.f32 0.00028619796, %v73_v10  ;;  %v85_v14 = vadd.f32 0.001143296, %v84_v11  ;;  %v360_v15 = vmul.f32 0.70710677, %v357_v12 }
  0x93   :  { %v86_v16 = vmul.f32 %v85_v14, %v72_v8  ;;  %v111_v17 = vmul.f32 %v360_v15, %v360_v15  ;;  %v75_v18 = vmul.f32 %v74_v13, %v72_v8 }
  0x95   :  { %v87_v19 = vadd.f32 0.014752088, %v86_v16  ;;  %v112_v20 = vmin.f32 %v111_v17, 16.0  ;;  %v76_v25 = vadd.f32 0.0036580483, %v75_v18 }
  0x97   :  { %v88_v21 = vmul.f32 %v87_v19, %v72_v8  ;;  %v113_v23 = vmul.f32 2.1237322e-06, %v112_v20  ;;  %v124_v24 = vmul.f32 3.8918573e-05, %v112_v20  ;;  %v77_v33 = vmul.f32 %v76_v25, %v72_v8 }
  0x98   :  { %v68_v25 = vmul.f32 0.5, %v357_v12 }
  0x99   :  { %v89_v26 = vadd.f32 0.112945676, %v88_v21  ;;  %v114_v27 = vadd.f32 0.00028619796, %v113_v23  ;;  %v125_v28 = vadd.f32 0.001143296, %v124_v24 }
  0x9a   :  { %v78_v40 = vadd.f32 0.05243302, %v77_v33  ;;  %v67_v24 = vmul.f32 0.5, %v350_v5 }
  0x9b   :  { %v90_v29 = vmul.f32 %v89_v26, %v72_v8  ;;  %v115_v31 = vmul.f32 %v114_v27, %v112_v20  ;;  %v126_v32 = vmul.f32 %v125_v28, %v112_v20 }
  0x9c   :  { %v79_v46 = vmul.f32 %v78_v40, %v72_v8 }
  0x9d   :  { %v91_v34 = vadd.f32 0.4994258, %v90_v29  ;;  %v116_v35 = vadd.f32 0.0036580483, %v115_v31  ;;  %v127_v36 = vadd.f32 0.014752088, %v126_v32 }
  0x9e   :  { %v80_v51 = vadd.f32 0.18741608, %v79_v46 }
  0x9f   :  { %v92_v37 = vmul.f32 %v91_v34, %v72_v8  ;;  %v128_v39 = vmul.f32 %v127_v36, %v112_v20  ;;  %v117_v42 = vmul.f32 %v116_v35, %v112_v20 }
  0xa0   :  { %v81_v56 = vmul.f32 %v80_v51, %v72_v8 }
  0xa1   :  { %v93_v41 = vadd.f32 1.0, %v92_v37  ;;  %v129_v43 = vadd.f32 0.112945676, %v128_v39  ;;  %v118_v47 = vadd.f32 0.05243302, %v117_v42 }
  0xa2   :  { %v82_v62 = vadd.f32 1.1283791, %v81_v56 }
  0xa3   :  { %274 = vrcp.f32 %v93_v41  ;;  %v130_v45 = vmul.f32 %v129_v43, %v112_v20  ;;  %v119_v53 = vmul.f32 %v118_v47, %v112_v20  ;;  %v105_v58 = vand.u32 2147483648, %v93_v41 }
  0xa4   :  { %v103_v60 = vand.u32 2147483647, %v93_v41  ;;  %vm99_vm2 = vweird.f32 %v93_v41  ;;  %v83_v7 = vmul.f32 %v82_v62, %v353_v6 }
  0xa5   :  { %v131_v48 = vadd.f32 0.4994258, %v130_v45  ;;  %v120_v59 = vadd.f32 0.18741608, %v119_v53  ;;  %v106_v1 = vor.u32 1.1754944e-38, %v105_v58 }
  0xa6   :  { %vm104_vm4 = vcmp.eq.f32.partialorder %v103_v60, 8.507059e+37 }
  0xa7   :  { %v132_v49 = vmul.f32 %v131_v48, %v112_v20  ;;  %v121_v2 = vmul.f32 %v120_v59, %v112_v20 }
  0xa9   :  { %v275_v50 = vpop.eup %274  ;;  %v133_v54 = vadd.f32 1.0, %v132_v49  ;;  %v122_v8 = vadd.f32 1.1283791, %v121_v2 }
  0xaa   :  { %v95_v52 = vmul.f32 %v275_v50, %v93_v41  ;;  %vm100_vm1 = vweird.f32 %v275_v50 }
  0xab   :  { %276 = vrcp.f32 %v133_v54  ;;  %vm101_vm3 = vmor %vm99_vm2, %vm100_vm1  ;;  %v145_v10 = vand.u32 2147483648, %v133_v54  ;;  %v143_v14 = vand.u32 2147483647, %v133_v54  ;;  %vm139_vm6 = vweird.f32 %v133_v54 }
  0xac   :  { %v96_v55 = vsub.f32 1.0, %v95_v52  ;;  %v123_v19 = vmul.f32 %v122_v8, %v360_v15  ;;  %v273_v15 = vld [vmem:[%s392_s4] ss:$0 sm:$0xff] }
  0xad   :  { %v146_v17 = vor.u32 1.1754944e-38, %v145_v10  ;;  %vm144_vm8 = vcmp.eq.f32.partialorder %v143_v14, 8.507059e+37 }
  0xae   :  { %v97_v57 = vmul.f32 %v275_v50, %v96_v55 }
  0xb0   :  { %v98_v61 = vadd.f32 %v275_v50, %v97_v57 }
  0xb1   :  { %v277_v63 = vpop.eup %276 }
  0xb2   :  { %v102_v0 = vsel %vm101_vm3, %v275_v50, %v98_v61  ;;  %v135_v3 = vmul.f32 %v277_v63, %v133_v54  ;;  %vm140_vm5 = vweird.f32 %v277_v63 }
  0xb3   :  { %v107_v4 = vsel %vm104_vm4, %v106_v1, %v102_v0  ;;  %vm141_vm7 = vmor %vm139_vm6, %vm140_vm5 }
  0xb4   :  { %v136_v9 = vsub.f32 1.0, %v135_v3  ;;  %v108_v11 = vmul.f32 %v107_v4, %v83_v7 }
  0xb6   :  { %v137_v13 = vmul.f32 %v277_v63, %v136_v9  ;;  %v243_v18 = vclamps-f32 %v108_v11, 1.0 }
  0xb8   :  { %v138_v16 = vadd.f32 %v277_v63, %v137_v13  ;;  %v151_v23 = vadd.f32 1.0, %v243_v18 }
  0xba   :  { %v142_v20 = vsel %vm141_vm7, %v277_v63, %v138_v16  ;;  %v153_v27 = vmul.f32 %v151_v23, %v67_v24 }
  0xbb   :  { %v147_v21 = vsel %vm144_vm8, %v146_v17, %v142_v20 }
  0xbc   :  { %v148_v22 = vmul.f32 %v147_v21, %v123_v19 }
  0xbe   :  { %v244_v6 = vclamps-f32 %v148_v22, 1.0 }
  0xc0   :  { %v152_v26 = vadd.f32 1.0, %v244_v6 }
  0xc2   :  { %v154_v28 = vmul.f32 %v152_v26, %v68_v25 }
  0xc4   :  { %v155_v29 = vpack.c.bf16 %v154_v28, %v153_v27 }
  0xc6   :  { %261 = vmatmul.msk.bf16.vlgmr.msra.gmra.mxu1 %vm192_vm9, %v155_v29 }
 0x143   :  { %v205_v30 = vpop.f32.mrf.mxu1 }
 0x144   :  { %v206_v31 = vadd.f32 %v273_v15, %v205_v30 }
 0x146   :  { %210 = vst.msk [vmem:[#allocation2] sm:$0xff] %vm49_vm0, %v206_v31 }
 0x14b   :  { %v207_v5 = vpop.f32.mrf.mxu1 }
 0x14c   :  { %v208_v12 = vadd.f32 %v273_v15, %v207_v5 }
 0x14e   :  { %211 = vst.msk [vmem:[#allocation2 + $0x8] sm:$0xff] %vm49_vm0, %v208_v12 }
 0x14f   :  { %224 = dma.vmem_to_hbm [thread:$0]  %s217_s8, 256, %s219_s11, [#allocation3], %s305_s12, %s305_s12, %s306_s13  }
 0x150   :  { %302 = dma.done.wait [#allocation3], 256  }
 0x151   :  { %303 = vsyncadd [#allocation3], 4294967040 }
 0x152   :  { %229 = vsyncpa [#allocation3], 1 }

</bundles_post_ra>
